<compile_context>
chip_gen: v5e
topology: v5e:2x2
jax: 0.10.0
libtpu: 0.0.40
codegen_flags: <defaults>
</compile_context>

<pallas_src>
import jax
import jax.numpy as jnp
from jax.experimental import pallas as pl
from jax.experimental.pallas import tpu as pltpu


# ---------------------------------------------------------------------------
# Kernel
# ---------------------------------------------------------------------------
def _critic_kernel(obs_ref, act_ref, wm_ref, wv_ref, out_ref):
    f32 = jnp.float32
    cdt = wm_ref.dtype                 # MXU operand dtype (bf16 default, f32 exact path)
    in_size = obs_ref.shape[1]

    # ---- tiny packed weights (constant index_map -> VMEM-resident, fetched once) ----
    w1s = wm_ref[0:16, 0:in_size]      # state  Linear(in,16) weight, (out, in)
    w2s = wm_ref[16:24, 0:16]          # state  Linear(16, 8) weight
    w2a = wm_ref[24:28, 0:16]          # action Linear(16, 4) weight
    f1s = wm_ref[32:48, 0:8]           # final  Linear(12,16) weight, state slice
    f1a = wm_ref[48:64, 0:4]           # final  Linear(12,16) weight, action slice
    b1s = wv_ref[0:16]                 # (16,1) f32 biases / VPU-side vectors
    aw1 = wv_ref[16:32]                # action Linear(1,16) weight, as a column
    ab1 = wv_ref[32:48]
    b2s = wv_ref[48:56]
    b2a = wv_ref[56:60]
    fb1 = wv_ref[64:80]
    fw2 = wv_ref[80:96]                # final Linear(16,1) weight column
    fb2 = wv_ref[96:97]

    obs = obs_ref[...].astype(cdt)     # (tile_b, in)  batch-major, as the DMA delivered it
    act = act_ref[...].astype(f32)     # (1, tile_b)   batch on lanes

    # State branch layer 1: W1s @ obs^T via an NT dot_general (contract the minor
    # dims of both operands) -> (16, tile_b) with the batch on the 128-lane axis.
    # No in-wrapper transpose/concat; everything downstream stays lane-dense.
    nt_dims = (((1,), (1,)), ((), ()))
    h1s = jax.lax.dot_general(w1s, obs, nt_dims, preferred_element_type=f32)
    h1s = jnp.maximum(h1s + b1s, 0.0)                                   # (16, tb) f32

    # Action branch layer 1 is Linear(1,16): a pure outer product -> VPU broadcast,
    # no MXU needed (f32 element-wise only, v5e-safe).
    h1a = jnp.maximum(aw1 * act + ab1, 0.0)                             # (16, tb) f32

    # Encoder outputs (linear, no activation on the MLP output layer).
    s_enc = jnp.dot(w2s, h1s.astype(cdt), preferred_element_type=f32) + b2s   # (8, tb)
    a_enc = jnp.dot(w2a, h1a.astype(cdt), preferred_element_type=f32) + b2a   # (4, tb)

    # relu(cat([s, a])) @ F1 + fb1 -- the concat is folded away by splitting the
    # 12-wide contraction into its 8-wide state and 4-wide action parts.
    s_act = jnp.maximum(s_enc, 0.0).astype(cdt)
    a_act = jnp.maximum(a_enc, 0.0).astype(cdt)
    h3 = (jnp.dot(f1s, s_act, preferred_element_type=f32)
          + jnp.dot(f1a, a_act, preferred_element_type=f32) + fb1)
    h3 = jnp.maximum(h3, 0.0)                                           # (16, tb) f32

    # Final Linear(16,1): VPU multiply + sublane reduce (cheaper than a 4th tiny
    # MXU dot with M=1); output stays lane-dense.
    q = jnp.sum(fw2 * h3, axis=0, keepdims=True) + fb2                  # (1, tb) f32
    out_ref[...] = q.astype(out_ref.dtype)


# ---------------------------------------------------------------------------
# Wrapper
# ---------------------------------------------------------------------------
def _round_up(x, m):
    return ((x + m - 1) // m) * m


def _pick_tiles(batch, max_tile_b):
    """Lane-tile size (multiple of 128) and tile count.

    - big tiles amortize the ~0.35us/grid-step overhead,
    - >= 2 tiles once the batch is large enough so both v7x TensorCores get work,
    - the tile adapts to the batch so padding stays small (zero for 'nice' B).
    """
    b_pad = _round_up(max(batch, 1), 128)
    n_tiles = pl.cdiv(b_pad, max(128, max_tile_b))
    if b_pad >= 4096:
        n_tiles = max(n_tiles, 2)
    tile_b = _round_up(pl.cdiv(b_pad, n_tiles), 128)
    n_tiles = pl.cdiv(b_pad, tile_b)
    return tile_b, n_tiles


def critic_forward(obs, act, params, *, max_tile_b=16384, mxu_dtype=jnp.bfloat16):
    """obs: (B, input_size), act: (B, 1) -> q: (B, 1) float32.

    obs streams in whatever dtype the caller provides (pass bf16 obs to halve the
    dominant HBM stream); MXU operands use `mxu_dtype` (bf16 default on all
    generations, float32 for an exact path); accumulation is always float32.
    """
    B, in_size = obs.shape
    assert act.shape == (B, 1)

    wm = params["packed"]["wm"].astype(mxu_dtype)   # tiny, cast cost negligible
    wv = params["packed"]["wv"]                     # f32 VPU-side vectors

    # Action column as a (1, B) row: free reshape of contiguous memory -- batch
    # rides the 128-lane axis with no transpose and no concat HBM pass.
    act_row = act.astype(jnp.float32).reshape(1, B)

    tile_b, n_tiles = _pick_tiles(B, max_tile_b)
    b_pad = tile_b * n_tiles
    obs_p, act_p = obs, act_row
    if b_pad != B:
        # Padding is bounded to < n_tiles*128 rows by _pick_tiles; for batches
        # that already match the tile grid this copy is skipped entirely.
        obs_p = jnp.pad(obs, ((0, b_pad - B), (0, 0)))
        act_p = jnp.pad(act_row, ((0, 0), (0, b_pad - B)))

    macs_per_row = in_size * 16 + 16 + 16 * 8 + 16 * 4 + 8 * 16 + 4 * 16 + 16
    cost = pl.CostEstimate(
        flops=2 * b_pad * macs_per_row,
        transcendentals=0,
        bytes_accessed=(int(obs_p.size) * obs_p.dtype.itemsize
                        + int(act_p.size) * 4 + b_pad * 4
                        + int(wm.size) * wm.dtype.itemsize + int(wv.size) * 4))

    out = pl.pallas_call(
        _critic_kernel,
        out_shape=jax.ShapeDtypeStruct((1, b_pad), jnp.float32),
        grid=(n_tiles,),
        in_specs=[
            pl.BlockSpec((tile_b, in_size), lambda i: (i, 0)),   # obs rows (batch-major)
            pl.BlockSpec((1, tile_b), lambda i: (0, i)),         # action row (batch on lanes)
            pl.BlockSpec(wm.shape, lambda i: (0, 0)),            # packed matrices (resident)
            pl.BlockSpec(wv.shape, lambda i: (0, 0)),            # packed vectors  (resident)
        ],
        out_specs=pl.BlockSpec((1, tile_b), lambda i: (0, i)),   # lane-dense q row
        compiler_params=pltpu.CompilerParams(
            dimension_semantics=("parallel",),          # shard tiles across v7x's 2 TCs
            vmem_limit_bytes=48 * 1024 * 1024),         # < v7x's 64MiB physical VMEM
        cost_estimate=cost,
    )(obs_p, act_p, wm, wv)

    return out[0, :B].reshape(B, 1)


# ---------------------------------------------------------------------------
# Parameter packing / init / pure-JAX reference
# ---------------------------------------------------------------------------
def _pack_params(p, input_size):
    """Pack all weights/biases into two small kernel-friendly buffers."""
    f32 = jnp.float32
    width = max(16, input_size)
    wm = jnp.zeros((64, width), f32)
    wm = wm.at[0:16, 0:input_size].set(p["sw1"].T)   # state  Linear(in,16)
    wm = wm.at[16:24, 0:16].set(p["sw2"].T)          # state  Linear(16,8)
    wm = wm.at[24:28, 0:16].set(p["aw2"].T)          # action Linear(16,4)
    fw1_t = p["fw1"].T                               # (16, 12)
    wm = wm.at[32:48, 0:8].set(fw1_t[:, 0:8])        # final  Linear(12,16), state slice
    wm = wm.at[48:64, 0:4].set(fw1_t[:, 8:12])       # final  Linear(12,16), action slice

    wv = jnp.zeros((128, 1), f32)
    wv = wv.at[0:16, 0].set(p["sb1"][0])             # state  layer-1 bias
    wv = wv.at[16:32, 0].set(p["aw1"][0])            # action Linear(1,16) weight column
    wv = wv.at[32:48, 0].set(p["ab1"][0])            # action layer-1 bias
    wv = wv.at[48:56, 0].set(p["sb2"][0])            # state  encoder output bias
    wv = wv.at[56:60, 0].set(p["ab2"][0])            # action encoder output bias
    wv = wv.at[64:80, 0].set(p["fb1"][0])            # final  layer-1 bias
    wv = wv.at[80:96, 0].set(p["fw2"][:, 0])         # final  Linear(16,1) weight column
    wv = wv.at[96, 0].set(p["fb2"][0, 0])            # final  output bias
    return {"wm": wm, "wv": wv}


def init_params(key, input_size=8):
    """Deterministic synthetic parameters matching the module's layer shapes."""
    ks = jax.random.split(key, 12)
    u = lambda k, shape, scale: jax.random.uniform(
        k, shape, jnp.float32, minval=-scale, maxval=scale)
    raw = dict(
        # state encoder: Linear(input_size,16) -> ReLU -> Linear(16,8)
        sw1=u(ks[0], (input_size, 16), 1.0 / jnp.sqrt(input_size)),
        sb1=u(ks[1], (1, 16), 1.0 / jnp.sqrt(input_size)),
        sw2=u(ks[2], (16, 8), 0.25), sb2=u(ks[3], (1, 8), 0.25),
        # action encoder: Linear(1,16) -> ReLU -> Linear(16,4)
        aw1=u(ks[4], (1, 16), 1.0), ab1=u(ks[5], (1, 16), 1.0),
        aw2=u(ks[6], (16, 4), 0.25), ab2=u(ks[7], (1, 4), 0.25),
        # final layer: Linear(12,16) -> ReLU -> Linear(16,1)
        fw1=u(ks[8], (12, 16), 1.0 / jnp.sqrt(12.0)),
        fb1=u(ks[9], (1, 16), 1.0 / jnp.sqrt(12.0)),
        fw2=u(ks[10], (16, 1), 0.25), fb2=u(ks[11], (1, 1), 0.25),
    )
    return {"raw": raw, "packed": _pack_params(raw, input_size)}


def critic_forward_ref(obs, act, params):
    """Pure-JAX reference mirroring the PyTorch module (highest-precision f32)."""
    r = params["raw"]
    dot = lambda a, b: jnp.dot(a, b, precision=jax.lax.Precision.HIGHEST)
    h_s = jnp.maximum(dot(obs, r["sw1"]) + r["sb1"], 0.0)
    s_enc = dot(h_s, r["sw2"]) + r["sb2"]
    h_a = jnp.maximum(dot(act, r["aw1"]) + r["ab1"], 0.0)
    a_enc = dot(h_a, r["aw2"]) + r["ab2"]
    sa = jnp.maximum(jnp.concatenate([s_enc, a_enc], axis=1), 0.0)
    h_f = jnp.maximum(dot(sa, r["fw1"]) + r["fb1"], 0.0)
    return dot(h_f, r["fw2"]) + r["fb2"]


# ---------------------------------------------------------------------------
# Demo / checks
# ---------------------------------------------------------------------------
if __name__ == "__main__":
    key = jax.random.PRNGKey(0)
    k_obs, k_act, k_par, k_obs2, k_act2 = jax.random.split(key, 5)

    B, INPUT_SIZE = 2, 8
    obs = jax.random.normal(k_obs, (B, INPUT_SIZE), jnp.float32)
    act = jax.random.normal(k_act, (B, 1), jnp.float32)
    params = init_params(k_par, input_size=INPUT_SIZE)

    # Small batch, exact (f32 MXU operands) path: tight check vs the reference.
    q = jax.block_until_ready(critic_forward(obs, act, params, mxu_dtype=jnp.float32))
    q_ref = critic_forward_ref(obs, act, params)
    assert q.shape == (B, 1)
    assert jnp.allclose(q, q_ref, atol=1e-5, rtol=1e-5)

    # Larger batch: multi-tile grid (2 parallel tiles on v7x) + ragged-tail padding.
    B2 = 5000
    obs2 = jax.random.normal(k_obs2, (B2, INPUT_SIZE), jnp.float32)
    act2 = jax.random.normal(k_act2, (B2, 1), jnp.float32)
    q2 = jax.block_until_ready(critic_forward(obs2, act2, params, mxu_dtype=jnp.float32))
    q2_ref = critic_forward_ref(obs2, act2, params)
    assert q2.shape == (B2, 1)
    assert jnp.allclose(q2, q2_ref, atol=1e-5, rtol=1e-5)

    # Default path: bf16 MXU operands (all generations), f32 accumulation.
    q2_bf = jax.block_until_ready(critic_forward(obs2, act2, params))
    assert jnp.allclose(q2_bf, q2_ref, atol=5e-2, rtol=5e-2)

    print("KERNEL_OK")
</pallas_src>

<mosaic_0001>
module attributes {stable_mosaic.version = 11 : i64} {
  func.func @_critic_kernel(%arg0: i32, %arg1: memref<128x8xf32, #tpu.memory_space<vmem>>, %arg2: memref<1x128xf32, #tpu.memory_space<vmem>>, %arg3: memref<64x16xf32, #tpu.memory_space<vmem>>, %arg4: memref<128x1xf32, #tpu.memory_space<vmem>>, %arg5: memref<1x128xf32, #tpu.memory_space<vmem>>) attributes {dimension_semantics = [#tpu.dimension_semantics<parallel>], iteration_bounds = array<i64: 1>, scalar_prefetch = 0 : i64, scratch_operands = 0 : i64, tpu.core_type = #tpu.core_type<tc>, window_params = [{transform_indices = @transform_0, window_bounds = array<i64: 128, 8>}, {transform_indices = @transform_1, window_bounds = array<i64: 1, 128>}, {pipeline_mode = #tpu.pipeline_mode<synchronous>, transform_indices = @transform_2, window_bounds = array<i64: 64, 16>}, {pipeline_mode = #tpu.pipeline_mode<synchronous>, transform_indices = @transform_3, window_bounds = array<i64: 128, 1>}, {transform_indices = @transform_4, window_bounds = array<i64: 1, 128>}]} {
    %c0 = arith.constant 0 : index
    %c0_0 = arith.constant 0 : index
    %0 = vector.load %arg3[%c0, %c0_0] : memref<64x16xf32, #tpu.memory_space<vmem>>, vector<16x8xf32>
    %c16 = arith.constant 16 : index
    %c0_1 = arith.constant 0 : index
    %1 = vector.load %arg3[%c16, %c0_1] : memref<64x16xf32, #tpu.memory_space<vmem>>, vector<8x16xf32>
    %c24 = arith.constant 24 : index
    %c0_2 = arith.constant 0 : index
    %2 = vector.load %arg3[%c24, %c0_2] : memref<64x16xf32, #tpu.memory_space<vmem>>, vector<4x16xf32>
    %c32 = arith.constant 32 : index
    %c0_3 = arith.constant 0 : index
    %3 = vector.load %arg3[%c32, %c0_3] : memref<64x16xf32, #tpu.memory_space<vmem>>, vector<16x8xf32>
    %c48 = arith.constant 48 : index
    %c0_4 = arith.constant 0 : index
    %4 = vector.load %arg3[%c48, %c0_4] : memref<64x16xf32, #tpu.memory_space<vmem>>, vector<16x4xf32>
    %c0_5 = arith.constant 0 : index
    %c0_6 = arith.constant 0 : index
    %5 = vector.load %arg4[%c0_5, %c0_6] : memref<128x1xf32, #tpu.memory_space<vmem>>, vector<16x1xf32>
    %c16_7 = arith.constant 16 : index
    %c0_8 = arith.constant 0 : index
    %6 = vector.load %arg4[%c16_7, %c0_8] : memref<128x1xf32, #tpu.memory_space<vmem>>, vector<16x1xf32>
    %c32_9 = arith.constant 32 : index
    %c0_10 = arith.constant 0 : index
    %7 = vector.load %arg4[%c32_9, %c0_10] : memref<128x1xf32, #tpu.memory_space<vmem>>, vector<16x1xf32>
    %c48_11 = arith.constant 48 : index
    %c0_12 = arith.constant 0 : index
    %8 = vector.load %arg4[%c48_11, %c0_12] : memref<128x1xf32, #tpu.memory_space<vmem>>, vector<8x1xf32>
    %c56 = arith.constant 56 : index
    %c0_13 = arith.constant 0 : index
    %9 = vector.load %arg4[%c56, %c0_13] : memref<128x1xf32, #tpu.memory_space<vmem>>, vector<4x1xf32>
    %c64 = arith.constant 64 : index
    %c0_14 = arith.constant 0 : index
    %10 = vector.load %arg4[%c64, %c0_14] : memref<128x1xf32, #tpu.memory_space<vmem>>, vector<16x1xf32>
    %c80 = arith.constant 80 : index
    %c0_15 = arith.constant 0 : index
    %11 = vector.load %arg4[%c80, %c0_15] : memref<128x1xf32, #tpu.memory_space<vmem>>, vector<16x1xf32>
    %c96 = arith.constant 96 : index
    %c0_16 = arith.constant 0 : index
    %12 = vector.load %arg4[%c96, %c0_16] : memref<128x1xf32, #tpu.memory_space<vmem>>, vector<1x1xf32>
    %c0_17 = arith.constant 0 : index
    %c0_18 = arith.constant 0 : index
    %13 = vector.load %arg1[%c0_17, %c0_18] : memref<128x8xf32, #tpu.memory_space<vmem>>, vector<128x8xf32>
    %c0_19 = arith.constant 0 : index
    %c0_20 = arith.constant 0 : index
    %14 = vector.load %arg2[%c0_19, %c0_20] : memref<1x128xf32, #tpu.memory_space<vmem>>, vector<1x128xf32>
    %cst = arith.constant dense<0.000000e+00> : vector<16x128xf32>
    %15 = tpu.matmul %0, %13, %cst {dimension_numbers = #tpu.dot_dimension_numbers<[1], [1], [0], [0], [0, 0, 1, 0], [], []>} : vector<16x8xf32>, vector<128x8xf32>, vector<16x128xf32> -> vector<16x128xf32>
    %16 = vector.broadcast %5 : vector<16x1xf32> to vector<16x128xf32>
    %17 = arith.addf %15, %16 : vector<16x128xf32>
    %cst_21 = arith.constant 0.000000e+00 : f32
    %18 = vector.broadcast %cst_21 : f32 to vector<16x128xf32>
    %19 = arith.maximumf %17, %18 : vector<16x128xf32>
    %20 = vector.broadcast %6 : vector<16x1xf32> to vector<16x128xf32>
    %21 = vector.broadcast %14 : vector<1x128xf32> to vector<16x128xf32>
    %22 = arith.mulf %20, %21 : vector<16x128xf32>
    %23 = vector.broadcast %7 : vector<16x1xf32> to vector<16x128xf32>
    %24 = arith.addf %22, %23 : vector<16x128xf32>
    %cst_22 = arith.constant 0.000000e+00 : f32
    %25 = vector.broadcast %cst_22 : f32 to vector<16x128xf32>
    %26 = arith.maximumf %24, %25 : vector<16x128xf32>
    %cst_23 = arith.constant dense<0.000000e+00> : vector<8x128xf32>
    %27 = tpu.matmul %1, %19, %cst_23 {dimension_numbers = #tpu.dot_dimension_numbers<[1], [0], [0], [1], [0, 0, 1, 1], [], []>} : vector<8x16xf32>, vector<16x128xf32>, vector<8x128xf32> -> vector<8x128xf32>
    %28 = vector.broadcast %8 : vector<8x1xf32> to vector<8x128xf32>
    %29 = arith.addf %27, %28 : vector<8x128xf32>
    %cst_24 = arith.constant dense<0.000000e+00> : vector<4x128xf32>
    %30 = tpu.matmul %2, %26, %cst_24 {dimension_numbers = #tpu.dot_dimension_numbers<[1], [0], [0], [1], [0, 0, 1, 1], [], []>} : vector<4x16xf32>, vector<16x128xf32>, vector<4x128xf32> -> vector<4x128xf32>
    %31 = vector.broadcast %9 : vector<4x1xf32> to vector<4x128xf32>
    %32 = arith.addf %30, %31 : vector<4x128xf32>
    %cst_25 = arith.constant 0.000000e+00 : f32
    %33 = vector.broadcast %cst_25 : f32 to vector<8x128xf32>
    %34 = arith.maximumf %29, %33 : vector<8x128xf32>
    %cst_26 = arith.constant 0.000000e+00 : f32
    %35 = vector.broadcast %cst_26 : f32 to vector<4x128xf32>
    %36 = arith.maximumf %32, %35 : vector<4x128xf32>
    %cst_27 = arith.constant dense<0.000000e+00> : vector<16x128xf32>
    %37 = tpu.matmul %3, %34, %cst_27 {dimension_numbers = #tpu.dot_dimension_numbers<[1], [0], [0], [1], [0, 0, 1, 1], [], []>} : vector<16x8xf32>, vector<8x128xf32>, vector<16x128xf32> -> vector<16x128xf32>
    %cst_28 = arith.constant dense<0.000000e+00> : vector<16x128xf32>
    %38 = tpu.matmul %4, %36, %cst_28 {dimension_numbers = #tpu.dot_dimension_numbers<[1], [0], [0], [1], [0, 0, 1, 1], [], []>} : vector<16x4xf32>, vector<4x128xf32>, vector<16x128xf32> -> vector<16x128xf32>
    %39 = arith.addf %37, %38 : vector<16x128xf32>
    %40 = vector.broadcast %10 : vector<16x1xf32> to vector<16x128xf32>
    %41 = arith.addf %39, %40 : vector<16x128xf32>
    %cst_29 = arith.constant 0.000000e+00 : f32
    %42 = vector.broadcast %cst_29 : f32 to vector<16x128xf32>
    %43 = arith.maximumf %41, %42 : vector<16x128xf32>
    %44 = vector.broadcast %11 : vector<16x1xf32> to vector<16x128xf32>
    %45 = arith.mulf %44, %43 : vector<16x128xf32>
    %cst_30 = arith.constant dense<0.000000e+00> : vector<128xf32>
    %46 = vector.multi_reduction <add>, %45, %cst_30 [0] : vector<16x128xf32> to vector<128xf32>
    %47 = vector.shape_cast %46 : vector<128xf32> to vector<1x128xf32>
    %48 = vector.broadcast %12 : vector<1x1xf32> to vector<1x128xf32>
    %49 = arith.addf %47, %48 : vector<1x128xf32>
    %c0_31 = arith.constant 0 : index
    %c0_32 = arith.constant 0 : index
    %50 = vector.load %arg5[%c0_31, %c0_32] : memref<1x128xf32, #tpu.memory_space<vmem>>, vector<1x128xf32>
    tpu.vector_store %arg5[%c0_31, %c0_32], %49 {strides = array<i32>} : memref<1x128xf32, #tpu.memory_space<vmem>>, vector<1x128xf32>,
    return
  }
  func.func @transform_0(%arg0: i32) -> (i32, i32) {
    %c0_i32 = arith.constant 0 : i32
    %c0_i32_0 = arith.constant 0 : i32
    return %arg0, %c0_i32 : i32, i32
  }
  func.func @transform_1(%arg0: i32) -> (i32, i32) {
    %c0_i32 = arith.constant 0 : i32
    %c0_i32_0 = arith.constant 0 : i32
    return %c0_i32, %arg0 : i32, i32
  }
  func.func @transform_2(%arg0: i32) -> (i32, i32) {
    %c0_i32 = arith.constant 0 : i32
    %c0_i32_0 = arith.constant 0 : i32
    %c0_i32_1 = arith.constant 0 : i32
    return %c0_i32, %c0_i32_0 : i32, i32
  }
  func.func @transform_3(%arg0: i32) -> (i32, i32) {
    %c0_i32 = arith.constant 0 : i32
    %c0_i32_0 = arith.constant 0 : i32
    %c0_i32_1 = arith.constant 0 : i32
    return %c0_i32, %c0_i32_0 : i32, i32
  }
  func.func @transform_4(%arg0: i32) -> (i32, i32) {
    %c0_i32 = arith.constant 0 : i32
    %c0_i32_0 = arith.constant 0 : i32
    return %c0_i32, %arg0 : i32, i32
  }
}

</mosaic_0001>

<bundles_post_ra>
// kernel: tpu_custom_call.1
= control target key start
LH: loop header
LB: loop body
LE: loop exit
PB: predicated region body
PF: predicated region fallthrough
CT: control target
= control target key end

     0   :  { %vm66_vm0 = vcmask 64512   ;;  %v410_v3 = vmov 0   ;;  %s574_s0 = inlined_call_operand.vmem [shape: f32[128,8], index: 0, kind: input, shape index: {}]   ;;  %s575_s1 = inlined_call_operand.vmem [shape: f32[1,128], index: 1, kind: input, shape index: {}]   ;;  %s576_s2 = inlined_call_operand.vmem [shape: f32[64,16], index: 2, kind: input, shape index: {}]   ;;  %s577_s3 = inlined_call_operand.vmem [shape: f32[128,1], index: 3, kind: input, shape index: {}]   ;;  %s578_s4 = inlined_call_operand.hbm [shape: f32[1,128], index: 4, kind: output, shape index: {}]  }
   0x1   :  { %v54_v0 = vld [vmem:[%s574_s0 + $0x78] sm:$0xff]  ;;  %v31_v2 = vld [vmem:[%s577_s3 + $0x28] sm:$0xff]  ;;  %380 = vset.pattern.permute.xlu0 %v410_v3  ;;  %381 = vset.pattern.permute.xlu1 %v410_v3  ;;  %v53_v4 = vld [vmem:[%s574_s0 + $0x70] sm:$0xff] }
   0x2   :  { %v29_v1 = vld [vmem:[%s577_s3 + $0x18] sm:$0xff]  ;;  %353 = vmatpush.xpose.msk.msra.mxu0 %vm66_vm0, %v54_v0  ;;  %168 = vperm.xlu1 %381, %v31_v2  }
   0x3   :  { %153 = vperm.xlu0 %380, %v29_v1   ;;  %382 = vset.pattern.permute.xlu2 %v410_v3 }
   0x6   :  { %354 = vmatpush.xpose.msk.msra.mxu0 %vm66_vm0, %v53_v4 }
   0x7   :  { %9 = vsyncpa [#allocation3], 0  ;;  %v52_v5 = vld [vmem:[%s574_s0 + $0x68] sm:$0xff]  ;;  %v28_v6 = vld [vmem:[%s577_s3 + $0x10] sm:$0xff]  ;;  %vm180_vm1 = vcmask 130048   ;;  %vm241_vm2 = vcmask 1043456  }
   0x8   :  { %v30_v7 = vld [vmem:[%s577_s3 + $0x20] sm:$0xff]  ;;  %v50_v9 = vld [vmem:[%s574_s0 + $0x58] sm:$0xff]  ;;  %v49_v11 = vld [vmem:[%s574_s0 + $0x50] sm:$0xff]  ;;  %vm234_vm3 = vcmask 31744   ;;  %s344_s13 = sshll.u32 %s578_s4, 4  ;;  %s345_s13 = int_to_ptr.hbm [resolvable:$true] %s344_s13 }
   0x9   :  { %v51_v8 = vld [vmem:[%s574_s0 + $0x60] sm:$0xff]  ;;  %v33_v10 = vld [vmem:[%s577_s3 + $0x38] sm:$0xf]  ;;  %v48_v12 = vld [vmem:[%s574_s0 + $0x48] sm:$0xff] }
   0xa   :  { %355 = vmatpush.xpose.msk.msra.mxu0 %vm66_vm0, %v52_v5  ;;  %163 = vperm.xlu1 %381, %v30_v7   ;;  %v35_v13 = vld [vmem:[%s577_s3 + $0x48] sm:$0xff]  ;;  %v32_v14 = vld [vmem:[%s577_s3 + $0x30] sm:$0xff]  ;;  %v47_v15 = vld [vmem:[%s574_s0 + $0x40] sm:$0xff] }
   0xb   :  { %148 = vperm.xlu0 %380, %v28_v6   ;;  %v46_v16 = vld [vmem:[%s574_s0 + $0x38] sm:$0xff]  ;;  %v38_v17 = vld [vmem:[%s577_s3 + $0x60] sm:$0x1]  ;;  %v36_v18 = vld [vmem:[%s577_s3 + $0x50] sm:$0xff] }
   0xc   :  { %v45_v19 = vld [vmem:[%s574_s0 + $0x30] sm:$0xff]  ;;  %v44_v20 = vld [vmem:[%s574_s0 + $0x28] sm:$0xff]  ;;  %v43_v22 = vld [vmem:[%s574_s0 + $0x20] sm:$0xff] }
   0xd   :  { %v27_v21 = vld [vmem:[%s577_s3 + $0x8] sm:$0xff]  ;;  %v42_v23 = vld [vmem:[%s574_s0 + $0x18] sm:$0xff]  ;;  %v26_v24 = vld [vmem:[%s577_s3] sm:$0xff] }
   0xe   :  { %356 = vmatpush.xpose.msk.msra.mxu0 %vm66_vm0, %v51_v8  ;;  %63 = vperm.xlu2 %382, %v27_v21   ;;  %v41_v25 = vld [vmem:[%s574_s0 + $0x10] sm:$0xff]  ;;  %v40_v26 = vld [vmem:[%s574_s0 + $0x8] sm:$0xff]  ;;  %v34_v27 = vld [vmem:[%s577_s3 + $0x40] sm:$0xff] }
   0xf   :  { %v39_v28 = vld [vmem:[%s574_s0] sm:$0xff]  ;;  %v37_v30 = vld [vmem:[%s577_s3 + $0x58] sm:$0xff]  ;;  %v19_v31 = vld [vmem:[%s576_s2 + $0x8] sm:$0xff] }
  0x10   :  { %v18_v29 = vld [vmem:[%s576_s2] sm:$0xff]  ;;  %v21_v43 = vld [vmem:[%s576_s2 + $0x18] sm:$0xf]  ;;  %v20_v52 = vld [vmem:[%s576_s2 + $0x10] sm:$0xff] }
  0x11   :  { %v383_v32 = vld [vmem:[%s575_s1] ss:$0 sm:$0xff]  ;;  %v24_v57 = vld [vmem:[%s576_s2 + $0x30] sm:$0xff]  ;;  %v25_v58 = vld [vmem:[%s576_s2 + $0x38] sm:$0xff] }
  0x12   :  { %357 = vmatpush.xpose.msk.msra.mxu0 %vm66_vm0, %v50_v9  ;;  %177 = vperm.xlu1 %381, %v32_v14   ;;  %v22_v63 = vld [vmem:[%s576_s2 + $0x20] sm:$0xff]  ;;  %v23_v0 = vld [vmem:[%s576_s2 + $0x28] sm:$0xff]  ;;  %s411_s2 = smov [#allocation2]  }
  0x13   :  { %206 = vperm.xlu0 %380, %v33_v10   ;;  %s342_s10 = sshll.u32 %s411_s2, 4  ;;  %s343_s10 = int_to_ptr.vmem [resolvable:$true] %s342_s10 }
  0x16   :  { %358 = vmatpush.xpose.msk.msra.mxu0 %vm66_vm0, %v49_v11  ;;  %58 = vperm.xlu2 %382, %v26_v24  }
  0x1a   :  { %359 = vmatpush.xpose.msk.msra.mxu0 %vm66_vm0, %v48_v12  ;;  %313 = vperm.xlu1 %381, %v36_v18  }
  0x1b   :  { %304 = vperm.xlu0 %380, %v35_v13  }
  0x1e   :  { %360 = vmatpush.xpose.msk.msra.mxu0 %vm66_vm0, %v47_v15  ;;  %299 = vperm.xlu2 %382, %v34_v27  }
  0x22   :  { %361 = vmatpush.xpose.msk.msra.mxu0 %vm66_vm0, %v46_v16 }
  0x23   :  { %332 = vperm.xlu0 %380, %v38_v17  }
  0x26   :  { %362 = vmatpush.xpose.msk.msra.mxu0 %vm66_vm0, %v45_v19  ;;  %318 = vperm.xlu2 %382, %v37_v30  }
  0x2a   :  { %363 = vmatpush.xpose.msk.msra.mxu0 %vm66_vm0, %v44_v20 }
  0x2e   :  { %364 = vmatpush.xpose.msk.msra.mxu0 %vm66_vm0, %v43_v22 }
  0x32   :  { %365 = vmatpush.xpose.msk.msra.mxu0 %vm66_vm0, %v42_v23 }
  0x36   :  { %366 = vmatpush.xpose.msk.msra.mxu0 %vm66_vm0, %v41_v25 }
  0x3a   :  { %367 = vmatpush.xpose.msk.msra.mxu0 %vm66_vm0, %v40_v26 }
  0x3e   :  { %368 = vmatpush.xpose.msk.msra.mxu0 %vm66_vm0, %v39_v28 }
  0x41   :  { %369 = vmatmul.msk.f32.vlgmr.msra.gmra.mxu0 %vm66_vm0, %v18_v29 }
  0x49   :  { %370 = vmatmul.msk.f32.gmra.mxu0 %vm66_vm0, %v19_v31 }
  0x68   :  { %v64_v44 = vpop.permute.xlu2 %63 }
  0x70   :  { %v59_v46 = vpop.permute.xlu2 %58 }
  0x74   :  { %v169_v35 = vpop.permute.xlu1 %168 }
  0x75   :  { %v154_v33 = vpop.permute.xlu0 %153 }
  0x76   :  { %v160_v34 = vmul.f32 %v383_v32, %v154_v33 }
  0x78   :  { %v172_v36 = vadd.f32 %v169_v35, %v160_v34  ;;  %v300_v4 = vpop.permute.xlu2 %299 }
  0x7a   :  { %v174_v37 = vmax.f32 %v172_v36, 0.0 }
  0x7c   :  { %226 = vmatpush.msra.mxu2 %v174_v37  ;;  %v164_v40 = vpop.permute.xlu1 %163 }
  0x7d   :  { %v149_v38 = vpop.permute.xlu0 %148 }
  0x7e   :  { %v159_v39 = vmul.f32 %v383_v32, %v149_v38 }
  0x80   :  { %v171_v41 = vadd.f32 %v164_v40, %v159_v39  ;;  %v319_v14 = vpop.permute.xlu2 %318 }
  0x82   :  { %v173_v42 = vmax.f32 %v171_v41, 0.0 }
  0x84   :  { %227 = vmatpush.msra.mxu2 %v173_v42  ;;  %v178_v59 = vpop.permute.xlu1 %177 }
  0x85   :  { %372 = vmatmul.msk.f32.vlgmr.msra.gmra.mxu2 %vm180_vm1, %v21_v43  ;;  %v207_v53 = vpop.permute.xlu0 %206 }
  0x8c   :  { %v314_v13 = vpop.permute.xlu1 %313 }
  0x8d   :  { %v305_v9 = vpop.permute.xlu0 %304 }
  0x95   :  { %v333_v24 = vpop.permute.xlu0 %332 }
  0xbe   :  { %v138_v45 = vpop.f32.mrf.mxu0 }
  0xbf   :  { %v139_v48 = vadd.f32 %v138_v45, %v59_v46 }
  0xc1   :  { %v144_v51 = vmax.f32 %v139_v48, 0.0 }
  0xc6   :  { %v141_v47 = vpop.f32.mrf.mxu0 }
  0xc7   :  { %v142_v49 = vadd.f32 %v141_v47, %v64_v44 }
  0xc9   :  { %v145_v50 = vmax.f32 %v142_v49, 0.0 }
  0xcb   :  { %198 = vmatpush.msra.mxu1 %v145_v50 }
  0xcd   :  { %199 = vmatpush.msra.mxu1 %v144_v51 }
  0xce   :  { %371 = vmatmul.msk.f32.vlgmr.msra.gmra.mxu1 %vm180_vm1, %v20_v52 }
 0x108   :  { %v229_v54 = vpop.f32.mrf.mxu2 }
 0x109   :  { %v230_v55 = vadd.f32 %v229_v54, %v207_v53 }
 0x10b   :  { %v233_v56 = vmax.f32 %v230_v55, 0.0 }
 0x10d   :  { %373 = vmatpush.msk.msra.mxu3 %vm241_vm2, %v233_v56 }
 0x10e   :  { %374 = vmatmul.msk.f32.vlgmr.msra.gmra.mxu3 %vm234_vm3, %v24_v57 }
 0x116   :  { %375 = vmatmul.msk.f32.gmra.mxu3 %vm234_vm3, %v25_v58 }
 0x14b   :  { %v201_v60 = vpop.f32.mrf.mxu1 }
 0x14c   :  { %v202_v61 = vadd.f32 %v201_v60, %v178_v59 }
 0x14e   :  { %v232_v62 = vmax.f32 %v202_v61, 0.0 }
 0x150   :  { %289 = vmatpush.msrb.mxu1 %v232_v62 }
 0x151   :  { %376 = vmatmul.msk.f32.vlgmr.msrb.gmra.mxu1 %vm66_vm0, %v22_v63 }
 0x159   :  { %377 = vmatmul.msk.f32.gmra.mxu1 %vm66_vm0, %v23_v0 }
 0x191   :  { %v262_v1 = vpop.f32.mrf.mxu3 }
 0x199   :  { %v265_v5 = vpop.f32.mrf.mxu3 }
 0x1ce   :  { %v291_v2 = vpop.f32.mrf.mxu1 }
 0x1cf   :  { %v292_v3 = vadd.f32 %v291_v2, %v262_v1 }
 0x1d1   :  { %v307_v6 = vadd.f32 %v300_v4, %v292_v3 }
 0x1d3   :  { %v309_v10 = vmax.f32 %v307_v6, 0.0 }
 0x1d5   :  { %v321_v15 = vmul.f32 %v314_v13, %v309_v10 }
 0x1d6   :  { %v294_v7 = vpop.f32.mrf.mxu1 }
 0x1d7   :  { %v295_v8 = vadd.f32 %v294_v7, %v265_v5 }
 0x1d9   :  { %v308_v11 = vadd.f32 %v305_v9, %v295_v8 }
 0x1db   :  { %v310_v12 = vmax.f32 %v308_v11, 0.0 }
 0x1dd   :  { %v322_v16 = vmul.f32 %v319_v14, %v310_v12 }
 0x1df   :  { %v323_v17 = vadd.f32 %v322_v16, %v321_v15 }
 0x1e1   :  { %v324_v18 = vrot.slane %v323_v17, 4 }
 0x1e3   :  { %v325_v19 = vadd.f32 %v324_v18, %v323_v17 }
 0x1e5   :  { %v326_v20 = vrot.slane %v325_v19, 2 }
 0x1e7   :  { %v327_v21 = vadd.f32 %v326_v20, %v325_v19 }
 0x1e9   :  { %v328_v22 = vrot.slane %v327_v21, 1 }
 0x1eb   :  { %v329_v23 = vadd.f32 %v328_v22, %v327_v21 }
 0x1ed   :  { %v335_v25 = vadd.f32 %v333_v24, %v329_v23 }
 0x1ef   :  { %336 = vst [vmem:[#allocation2] sm:$0x1] %v335_v25 }
 0x1f0   :  { %347 = dma.vmem_to_hbm [thread:$0]  %s343_s10, 16, %s345_s13, [#allocation3]  }
 0x1f1   :  { %408 = dma.done.wait [#allocation3], 16  }
 0x1f2   :  { %409 = vsyncadd [#allocation3], 4294967280 }
 0x1f3   :  { %352 = vsyncpa [#allocation3], 1 }

</bundles_post_ra>
